<compile_context>
chip_gen: v5e
topology: v5e:2x2
jax: 0.10.0
libtpu: 0.0.40
codegen_flags: <defaults>
</compile_context>

<pallas_src>
import functools

import jax
import jax.numpy as jnp
from jax.experimental import pallas as pl
from jax.experimental.pallas import tpu as pltpu


def _round_up(x, m):
    return ((x + m - 1) // m) * m


def _generator_kernel(noise_ref, cond_ref, w1n_ref, w1c_ref, b1_ref,
                      w2_ref, b2_ref, w3_ref, b3_ref, o_ref):
    """Whole 3-layer MLP for one batch tile.

    Matmul operands are bf16 (native MXU path on v5e/v6e/v7x); accumulation,
    bias adds and activations stay in f32.
    """
    noise = noise_ref[...].astype(jnp.bfloat16)
    cond = cond_ref[...].astype(jnp.bfloat16)

    # Layer 1: cat([noise, cond], 1) @ W1 == noise @ W1n + cond @ W1c
    h1 = jnp.dot(noise, w1n_ref[...], preferred_element_type=jnp.float32)
    h1 = h1 + jnp.dot(cond, w1c_ref[...], preferred_element_type=jnp.float32)
    h1 = h1 + b1_ref[...]
    h1 = jnp.where(h1 > 0, h1, 0.2 * h1)              # LeakyReLU(0.2)

    # Layer 2 + LeakyReLU(0.2)
    h2 = jnp.dot(h1.astype(jnp.bfloat16), w2_ref[...],
                 preferred_element_type=jnp.float32)
    h2 = h2 + b2_ref[...]
    h2 = jnp.where(h2 > 0, h2, 0.2 * h2)

    # Layer 3 + tanh.  Output columns are zero-padded to a multiple of 128
    # (lane-dense stores); padded columns give tanh(0) = 0 and are sliced off
    # in the wrapper.
    h3 = jnp.dot(h2.astype(jnp.bfloat16), w3_ref[...],
                 preferred_element_type=jnp.float32)
    h3 = h3 + b3_ref[...]
    o_ref[...] = jnp.tanh(h3).astype(o_ref.dtype)


def init_generator_params(key, noise_dim, condition_dim, output_dim):
    """Deterministic init mimicking nn.Linear default (U(-1/sqrt(fan_in), ...))."""
    dims = [(noise_dim + condition_dim, 128), (128, 256), (256, output_dim)]
    params = {}
    for idx, (fan_in, fan_out) in enumerate(dims, start=1):
        key, kw, kb = jax.random.split(key, 3)
        bound = 1.0 / jnp.sqrt(fan_in)
        params[f"w{idx}"] = jax.random.uniform(
            kw, (fan_in, fan_out), jnp.float32, -bound, bound)
        params[f"b{idx}"] = jax.random.uniform(
            kb, (1, fan_out), jnp.float32, -bound, bound)
    return params


def prepare_generator_params(params, noise_dim):
    """One-time parameter prep, hoisted out of the per-call path:

      * W1 split at the noise/condition boundary (removes the input concat),
      * W3/b3 zero-padded on the output dim to a lane-dense multiple of 128,
      * weights cast to bfloat16 (native MXU operand dtype),
      * biases kept in float32 (added after the f32-accumulated matmul).
    """
    w1, b1 = params["w1"], params["b1"]
    w2, b2 = params["w2"], params["b2"]
    w3, b3 = params["w3"], params["b3"]
    d_out = w3.shape[1]
    d_out_p = _round_up(d_out, 128)
    if d_out_p != d_out:
        w3 = jnp.pad(w3, ((0, 0), (0, d_out_p - d_out)))
        b3 = jnp.pad(b3, ((0, 0), (0, d_out_p - d_out)))
    return {
        "w1n": w1[:noise_dim].astype(jnp.bfloat16),   # noise rows of W1
        "w1c": w1[noise_dim:].astype(jnp.bfloat16),   # condition rows of W1
        "b1": b1.astype(jnp.float32),
        "w2": w2.astype(jnp.bfloat16),
        "b2": b2.astype(jnp.float32),
        "w3": w3.astype(jnp.bfloat16),                # lane-padded
        "b3": b3.astype(jnp.float32),                 # lane-padded
    }


def _num_tensorcores_per_chip():
    """Best-effort chip probe: only v7x packs two TensorCores per chip."""
    try:
        kind = jax.devices()[0].device_kind.lower()
    except Exception:
        return 1
    return 2 if "v7" in kind else 1


def _choose_block_b(batch, num_cores):
    """MXU-friendly batch tile (multiple of 8, capped at 1024 rows).

    v5e/v6e (1 TC): the grid is a serial loop, so keep a single big tile —
    splitting only adds ~0.35us/step and halves the matmul M per step.
    v7x (2 TCs): split large batches into two tiles so both cores get work.
    """
    if num_cores >= 2 and batch > 256:
        return min(_round_up(pl.cdiv(batch, num_cores), 8), 1024)
    return min(_round_up(batch, 8), 1024)


@functools.partial(jax.jit, static_argnames=("out_dim", "block_b"))
def generator_forward(noise, condition, prepped, *, out_dim, block_b=None):
    """Runs the Generator forward pass with a single fused Pallas kernel.

    noise:     (B, noise_dim) f32
    condition: (B, condition_dim) f32
    prepped:   output of prepare_generator_params()
    out_dim:   original (unpadded) output feature count (static)
    """
    B, noise_dim = noise.shape
    _, cond_dim = condition.shape
    d_h1 = prepped["w1n"].shape[1]
    d_h2 = prepped["w2"].shape[1]
    d_out_p = prepped["w3"].shape[1]

    num_cores = _num_tensorcores_per_chip()
    if block_b is None:
        block_b = _choose_block_b(B, num_cores)
    grid_len = pl.cdiv(B, block_b)

    # Only CORE_PARALLEL actually shards grid steps across v7x's two
    # TensorCores; on 1-TC chips the axis is a serial loop either way.
    if num_cores >= 2 and grid_len >= 2:
        semantics = (getattr(pltpu, "CORE_PARALLEL", "parallel"),)
    else:
        semantics = ("arbitrary",)

    d_in = noise_dim + cond_dim
    flops = 2 * B * (d_in * d_h1 + d_h1 * d_h2 + d_h2 * d_out_p)
    bytes_accessed = (4 * B * (noise_dim + cond_dim + d_out_p)          # acts f32
                      + 2 * (d_in * d_h1 + d_h1 * d_h2 + d_h2 * d_out_p)  # weights bf16
                      + 4 * (d_h1 + d_h2 + d_out_p))                    # biases f32
    cost = pl.CostEstimate(flops=flops,
                           transcendentals=B * d_out_p,
                           bytes_accessed=bytes_accessed)

    def bcast(shape):
        # Weights/biases are broadcast to every batch tile.
        return pl.BlockSpec(shape, lambda i: (0, 0))

    out = pl.pallas_call(
        _generator_kernel,
        out_shape=jax.ShapeDtypeStruct((B, d_out_p), jnp.float32),
        grid_spec=pltpu.PrefetchScalarGridSpec(
            num_scalar_prefetch=0,
            grid=(grid_len,),
            in_specs=[
                pl.BlockSpec((block_b, noise_dim), lambda i: (i, 0)),  # noise
                pl.BlockSpec((block_b, cond_dim), lambda i: (i, 0)),   # cond
                bcast((noise_dim, d_h1)),   # W1 (noise rows), bf16
                bcast((cond_dim, d_h1)),    # W1 (condition rows), bf16
                bcast((1, d_h1)),           # b1, f32
                bcast((d_h1, d_h2)),        # W2, bf16
                bcast((1, d_h2)),           # b2, f32
                bcast((d_h2, d_out_p)),     # W3 (lane-padded), bf16
                bcast((1, d_out_p)),        # b3 (lane-padded), f32
            ],
            out_specs=pl.BlockSpec((block_b, d_out_p), lambda i: (i, 0)),
        ),
        compiler_params=pltpu.CompilerParams(dimension_semantics=semantics),
        cost_estimate=cost,
    )(noise, condition,
      prepped["w1n"], prepped["w1c"], prepped["b1"],
      prepped["w2"], prepped["b2"], prepped["w3"], prepped["b3"])

    if out_dim != d_out_p:
        out = out[:, :out_dim]
    return out


def _reference_forward(noise, condition, params):
    """Pure-JAX f32 reference (matches the PyTorch module semantics)."""
    x = jnp.concatenate([noise, condition], axis=1)
    h = x @ params["w1"] + params["b1"]
    h = jnp.where(h > 0, h, 0.2 * h)
    h = h @ params["w2"] + params["b2"]
    h = jnp.where(h > 0, h, 0.2 * h)
    h = h @ params["w3"] + params["b3"]
    return jnp.tanh(h)


if __name__ == "__main__":
    noise_dim, condition_dim, output_dim = 16, 16, 32

    key = jax.random.PRNGKey(0)
    key, k_params = jax.random.split(key)
    params = init_generator_params(k_params, noise_dim, condition_dim,
                                   output_dim)
    prepped = prepare_generator_params(params, noise_dim)   # one-time prep

    # (batch, explicit block_b): aligned batch; ragged batch (partial-tile
    # masking, no input padding); multi-step grid with a ragged final tile.
    cases = [(8, None), (13, None), (40, 16)]
    for batch, bb in cases:
        key, k_noise, k_cond = jax.random.split(key, 3)
        noise = jax.random.normal(k_noise, (batch, noise_dim), jnp.float32)
        condition = jax.random.normal(k_cond, (batch, condition_dim),
                                      jnp.float32)

        out = generator_forward(noise, condition, prepped,
                                out_dim=output_dim, block_b=bb)
        out = jax.block_until_ready(out)

        ref = _reference_forward(noise, condition, params)
        assert out.shape == (batch, output_dim)
        # bf16 MXU operands vs f32 reference -> loosened tolerance.
        max_err = float(jnp.max(jnp.abs(out - ref)))
        assert jnp.allclose(out, ref, atol=5e-2, rtol=0.0), (
            f"mismatch vs reference (batch={batch}, max_abs_err={max_err})")

    print("KERNEL_OK")
</pallas_src>

<mosaic_0001>
module attributes {stable_mosaic.version = 11 : i64} {
  func.func @_generator_kernel(%arg0: i32, %arg1: memref<8x16xf32, #tpu.memory_space<vmem>>, %arg2: memref<8x16xf32, #tpu.memory_space<vmem>>, %arg3: memref<16x128xbf16, #tpu.memory_space<vmem>>, %arg4: memref<16x128xbf16, #tpu.memory_space<vmem>>, %arg5: memref<1x128xf32, #tpu.memory_space<vmem>>, %arg6: memref<128x256xbf16, #tpu.memory_space<vmem>>, %arg7: memref<1x256xf32, #tpu.memory_space<vmem>>, %arg8: memref<256x128xbf16, #tpu.memory_space<vmem>>, %arg9: memref<1x128xf32, #tpu.memory_space<vmem>>, %arg10: memref<8x128xf32, #tpu.memory_space<vmem>>) attributes {dimension_semantics = [#tpu.dimension_semantics<arbitrary>], iteration_bounds = array<i64: 1>, scalar_prefetch = 0 : i64, scratch_operands = 0 : i64, tpu.core_type = #tpu.core_type<tc>, window_params = [{transform_indices = @transform_0, window_bounds = array<i64: 8, 16>}, {transform_indices = @transform_1, window_bounds = array<i64: 8, 16>}, {pipeline_mode = #tpu.pipeline_mode<synchronous>, transform_indices = @transform_2, window_bounds = array<i64: 16, 128>}, {pipeline_mode = #tpu.pipeline_mode<synchronous>, transform_indices = @transform_3, window_bounds = array<i64: 16, 128>}, {pipeline_mode = #tpu.pipeline_mode<synchronous>, transform_indices = @transform_4, window_bounds = array<i64: 1, 128>}, {pipeline_mode = #tpu.pipeline_mode<synchronous>, transform_indices = @transform_5, window_bounds = array<i64: 128, 256>}, {pipeline_mode = #tpu.pipeline_mode<synchronous>, transform_indices = @transform_6, window_bounds = array<i64: 1, 256>}, {pipeline_mode = #tpu.pipeline_mode<synchronous>, transform_indices = @transform_7, window_bounds = array<i64: 256, 128>}, {pipeline_mode = #tpu.pipeline_mode<synchronous>, transform_indices = @transform_8, window_bounds = array<i64: 1, 128>}, {transform_indices = @transform_9, window_bounds = array<i64: 8, 128>}]} {
    %c0 = arith.constant 0 : index
    %c0_0 = arith.constant 0 : index
    %0 = vector.load %arg1[%c0, %c0_0] : memref<8x16xf32, #tpu.memory_space<vmem>>, vector<8x16xf32>
    %1 = arith.truncf %0 : vector<8x16xf32> to vector<8x16xbf16>
    %c0_1 = arith.constant 0 : index
    %c0_2 = arith.constant 0 : index
    %2 = vector.load %arg2[%c0_1, %c0_2] : memref<8x16xf32, #tpu.memory_space<vmem>>, vector<8x16xf32>
    %3 = arith.truncf %2 : vector<8x16xf32> to vector<8x16xbf16>
    %c0_3 = arith.constant 0 : index
    %c0_4 = arith.constant 0 : index
    %4 = vector.load %arg3[%c0_3, %c0_4] : memref<16x128xbf16, #tpu.memory_space<vmem>>, vector<16x128xbf16>
    %cst = arith.constant dense<0.000000e+00> : vector<8x128xf32>
    %5 = tpu.matmul %1, %4, %cst {dimension_numbers = #tpu.dot_dimension_numbers<[1], [0], [0], [1], [0, 0, 1, 1], [], []>} : vector<8x16xbf16>, vector<16x128xbf16>, vector<8x128xf32> -> vector<8x128xf32>
    %c0_5 = arith.constant 0 : index
    %c0_6 = arith.constant 0 : index
    %6 = vector.load %arg4[%c0_5, %c0_6] : memref<16x128xbf16, #tpu.memory_space<vmem>>, vector<16x128xbf16>
    %cst_7 = arith.constant dense<0.000000e+00> : vector<8x128xf32>
    %7 = tpu.matmul %3, %6, %cst_7 {dimension_numbers = #tpu.dot_dimension_numbers<[1], [0], [0], [1], [0, 0, 1, 1], [], []>} : vector<8x16xbf16>, vector<16x128xbf16>, vector<8x128xf32> -> vector<8x128xf32>
    %8 = arith.addf %5, %7 : vector<8x128xf32>
    %c0_8 = arith.constant 0 : index
    %c0_9 = arith.constant 0 : index
    %9 = vector.load %arg5[%c0_8, %c0_9] : memref<1x128xf32, #tpu.memory_space<vmem>>, vector<1x128xf32>
    %10 = vector.broadcast %9 : vector<1x128xf32> to vector<8x128xf32>
    %11 = arith.addf %8, %10 : vector<8x128xf32>
    %cst_10 = arith.constant 0.000000e+00 : f32
    %12 = vector.broadcast %cst_10 : f32 to vector<8x128xf32>
    %13 = arith.cmpf ogt, %11, %12 : vector<8x128xf32>
    %cst_11 = arith.constant 2.000000e-01 : f32
    %14 = vector.broadcast %cst_11 : f32 to vector<8x128xf32>
    %15 = arith.mulf %14, %11 : vector<8x128xf32>
    %16 = arith.select %13, %11, %15 : vector<8x128xi1>, vector<8x128xf32>
    %17 = arith.truncf %16 : vector<8x128xf32> to vector<8x128xbf16>
    %c0_12 = arith.constant 0 : index
    %c0_13 = arith.constant 0 : index
    %18 = vector.load %arg6[%c0_12, %c0_13] : memref<128x256xbf16, #tpu.memory_space<vmem>>, vector<128x256xbf16>
    %cst_14 = arith.constant dense<0.000000e+00> : vector<8x256xf32>
    %19 = tpu.matmul %17, %18, %cst_14 {dimension_numbers = #tpu.dot_dimension_numbers<[1], [0], [0], [1], [0, 0, 1, 1], [], []>} : vector<8x128xbf16>, vector<128x256xbf16>, vector<8x256xf32> -> vector<8x256xf32>
    %c0_15 = arith.constant 0 : index
    %c0_16 = arith.constant 0 : index
    %20 = vector.load %arg7[%c0_15, %c0_16] : memref<1x256xf32, #tpu.memory_space<vmem>>, vector<1x256xf32>
    %21 = vector.broadcast %20 : vector<1x256xf32> to vector<8x256xf32>
    %22 = arith.addf %19, %21 : vector<8x256xf32>
    %cst_17 = arith.constant 0.000000e+00 : f32
    %23 = vector.broadcast %cst_17 : f32 to vector<8x256xf32>
    %24 = arith.cmpf ogt, %22, %23 : vector<8x256xf32>
    %cst_18 = arith.constant 2.000000e-01 : f32
    %25 = vector.broadcast %cst_18 : f32 to vector<8x256xf32>
    %26 = arith.mulf %25, %22 : vector<8x256xf32>
    %27 = arith.select %24, %22, %26 : vector<8x256xi1>, vector<8x256xf32>
    %28 = arith.truncf %27 : vector<8x256xf32> to vector<8x256xbf16>
    %c0_19 = arith.constant 0 : index
    %c0_20 = arith.constant 0 : index
    %29 = vector.load %arg8[%c0_19, %c0_20] : memref<256x128xbf16, #tpu.memory_space<vmem>>, vector<256x128xbf16>
    %cst_21 = arith.constant dense<0.000000e+00> : vector<8x128xf32>
    %30 = tpu.matmul %28, %29, %cst_21 {dimension_numbers = #tpu.dot_dimension_numbers<[1], [0], [0], [1], [0, 0, 1, 1], [], []>} : vector<8x256xbf16>, vector<256x128xbf16>, vector<8x128xf32> -> vector<8x128xf32>
    %c0_22 = arith.constant 0 : index
    %c0_23 = arith.constant 0 : index
    %31 = vector.load %arg9[%c0_22, %c0_23] : memref<1x128xf32, #tpu.memory_space<vmem>>, vector<1x128xf32>
    %32 = vector.broadcast %31 : vector<1x128xf32> to vector<8x128xf32>
    %33 = arith.addf %30, %32 : vector<8x128xf32>
    %34 = math.tanh %33 : vector<8x128xf32>
    %c0_24 = arith.constant 0 : index
    %c0_25 = arith.constant 0 : index
    %35 = vector.load %arg10[%c0_24, %c0_25] : memref<8x128xf32, #tpu.memory_space<vmem>>, vector<8x128xf32>
    tpu.vector_store %arg10[%c0_24, %c0_25], %34 {strides = array<i32>} : memref<8x128xf32, #tpu.memory_space<vmem>>, vector<8x128xf32>,
    return
  }
  func.func @transform_0(%arg0: i32) -> (i32, i32) {
    %c0_i32 = arith.constant 0 : i32
    %c0_i32_0 = arith.constant 0 : i32
    return %arg0, %c0_i32 : i32, i32
  }
  func.func @transform_1(%arg0: i32) -> (i32, i32) {
    %c0_i32 = arith.constant 0 : i32
    %c0_i32_0 = arith.constant 0 : i32
    return %arg0, %c0_i32 : i32, i32
  }
  func.func @transform_2(%arg0: i32) -> (i32, i32) {
    %c0_i32 = arith.constant 0 : i32
    %c0_i32_0 = arith.constant 0 : i32
    %c0_i32_1 = arith.constant 0 : i32
    return %c0_i32, %c0_i32_0 : i32, i32
  }
  func.func @transform_3(%arg0: i32) -> (i32, i32) {
    %c0_i32 = arith.constant 0 : i32
    %c0_i32_0 = arith.constant 0 : i32
    %c0_i32_1 = arith.constant 0 : i32
    return %c0_i32, %c0_i32_0 : i32, i32
  }
  func.func @transform_4(%arg0: i32) -> (i32, i32) {
    %c0_i32 = arith.constant 0 : i32
    %c0_i32_0 = arith.constant 0 : i32
    %c0_i32_1 = arith.constant 0 : i32
    return %c0_i32, %c0_i32_0 : i32, i32
  }
  func.func @transform_5(%arg0: i32) -> (i32, i32) {
    %c0_i32 = arith.constant 0 : i32
    %c0_i32_0 = arith.constant 0 : i32
    %c0_i32_1 = arith.constant 0 : i32
    return %c0_i32, %c0_i32_0 : i32, i32
  }
  func.func @transform_6(%arg0: i32) -> (i32, i32) {
    %c0_i32 = arith.constant 0 : i32
    %c0_i32_0 = arith.constant 0 : i32
    %c0_i32_1 = arith.constant 0 : i32
    return %c0_i32, %c0_i32_0 : i32, i32
  }
  func.func @transform_7(%arg0: i32) -> (i32, i32) {
    %c0_i32 = arith.constant 0 : i32
    %c0_i32_0 = arith.constant 0 : i32
    %c0_i32_1 = arith.constant 0 : i32
    return %c0_i32, %c0_i32_0 : i32, i32
  }
  func.func @transform_8(%arg0: i32) -> (i32, i32) {
    %c0_i32 = arith.constant 0 : i32
    %c0_i32_0 = arith.constant 0 : i32
    %c0_i32_1 = arith.constant 0 : i32
    return %c0_i32, %c0_i32_0 : i32, i32
  }
  func.func @transform_9(%arg0: i32) -> (i32, i32) {
    %c0_i32 = arith.constant 0 : i32
    %c0_i32_0 = arith.constant 0 : i32
    return %arg0, %c0_i32 : i32, i32
  }
}

</mosaic_0001>

<bundles_post_ra>
// kernel: generator_forward.1
= control target key start
LH: loop header
LB: loop body
LE: loop exit
PB: predicated region body
PF: predicated region fallthrough
CT: control target
= control target key end

     0   :  { %14 = vsyncpa [#allocation3], 0  ;;  %s1008_s0 = inlined_call_operand.hbm [shape: f32[8,16], index: 0, kind: input, shape index: {}]   ;;  %s1009_s1 = inlined_call_operand.hbm [shape: f32[8,16], index: 1, kind: input, shape index: {}]   ;;  %s1010_s2 = inlined_call_operand.hbm [shape: bf16[16,128], index: 2, kind: input, shape index: {}]   ;;  %s1011_s3 = inlined_call_operand.hbm [shape: bf16[16,128], index: 3, kind: input, shape index: {}]   ;;  %s1012_s4 = inlined_call_operand.hbm [shape: f32[1,128], index: 4, kind: input, shape index: {}]   ;;  %s1013_s5 = inlined_call_operand.hbm [shape: bf16[128,256], index: 5, kind: input, shape index: {}]   ;;  %s1014_s6 = inlined_call_operand.vmem [shape: f32[1,256], index: 6, kind: input, shape index: {}]   ;;  %s1015_s7 = inlined_call_operand.hbm [shape: bf16[256,128], index: 7, kind: input, shape index: {}]   ;;  %s1016_s8 = inlined_call_operand.vmem [shape: f32[1,128], index: 8, kind: input, shape index: {}]   ;;  %s1017_s9 = inlined_call_operand.hbm [shape: f32[8,128], index: 9, kind: output, shape index: {}]  }
   0x1   :  { %15 = vsyncpa [#allocation6], 0 }
   0x2   :  { %16 = vsyncpa [#allocation9], 0 }
   0x3   :  { %17 = vsyncpa [#allocation12], 0  ;;  %s35_s11 = sshll.u32 %s1009_s1, 4  ;;  %s36_s11 = int_to_ptr.hbm [resolvable:$true] %s35_s11 }
   0x4   :  { %18 = vsyncpa [#allocation4], 0  ;;  %s905_s12 = smov [#allocation5]   ;;  %s58_s16 = sshll.u32 %s1011_s3, 4  ;;  %s59_s16 = int_to_ptr.hbm [resolvable:$true] %s58_s16 }
   0x5   :  { %s37_s13 = sshll.u32 %s905_s12, 4  ;;  %s906_s17 = smov [#allocation8]   ;;  %s38_s13 = int_to_ptr.vmem [resolvable:$true] %s37_s13 }
   0x6   :  { %40 = dma.hbm_to_vmem [thread:$0]  %s36_s11, 128, %s38_s13, [#allocation6]  }
   0x7   :  { %s60_s18 = sshll.u32 %s906_s17, 4  ;;  %s82_s21 = sshll.u32 %s1013_s5, 4  ;;  %s61_s18 = int_to_ptr.vmem [resolvable:$true] %s60_s18  ;;  %s83_s21 = int_to_ptr.hbm [resolvable:$true] %s82_s21 }
   0x8   :  { %s907_s1 = smov 64   ;;  %s908_s22 = smov 4  }
   0x9   :  { %66 = dma.hbm_to_vmem [thread:$0]  %s59_s16, 128, %s61_s18, [#allocation9], %s907_s1, %s907_s1, %s908_s22  }
   0xa   :  { %s909_s23 = smov [#allocation11]   ;;  %s24_s26 = sshll.u32 %s1008_s0, 4  ;;  %s25_s26 = int_to_ptr.hbm [resolvable:$true] %s24_s26 }
   0xb   :  { %s84_s24 = sshll.u32 %s909_s23, 4  ;;  %s910_s27 = smov 128   ;;  %s85_s24 = int_to_ptr.vmem [resolvable:$true] %s84_s24 }
   0xc   :  { %s911_s28 = smov 8   ;;  %s912_s5 = smov [#allocation2]  }
   0xd   :  { %90 = dma.hbm_to_vmem [thread:$0]  %s83_s21, 2048, %s85_s24, [#allocation12], %s910_s27, %s910_s27, %s911_s28  }
   0xe   :  { %s26_s29 = sshll.u32 %s912_s5, 4  ;;  %s45_s11 = sshll.u32 %s1010_s2, 4  ;;  %s27_s29 = int_to_ptr.vmem [resolvable:$true] %s26_s29  ;;  %s46_s11 = int_to_ptr.hbm [resolvable:$true] %s45_s11 }
   0xf   :  { %29 = dma.hbm_to_vmem [thread:$0]  %s25_s26, 128, %s27_s29, [#allocation3]  }
  0x10   :  { %s72_s14 = sshll.u32 %s1012_s4, 4  ;;  %s913_s15 = smov [#allocation7]   ;;  %s73_s14 = int_to_ptr.hbm [resolvable:$true] %s72_s14 }
  0x11   :  { %s47_s16 = sshll.u32 %s913_s15, 4  ;;  %s914_s0 = smov [#allocation10]   ;;  %s48_s16 = int_to_ptr.vmem [resolvable:$true] %s47_s16 }
  0x12   :  { %53 = dma.hbm_to_vmem [thread:$0]  %s46_s11, 128, %s48_s16, [#allocation6], %s907_s1, %s907_s1, %s908_s22  }
  0x13   :  { %s74_s17 = sshll.u32 %s914_s0, 4  ;;  %s97_s2 = sshll.u32 %s1015_s7, 4  ;;  %s75_s17 = int_to_ptr.vmem [resolvable:$true] %s74_s17  ;;  %s98_s2 = int_to_ptr.hbm [resolvable:$true] %s97_s2 }
  0x14   :  { %77 = dma.hbm_to_vmem [thread:$0]  %s73_s14, 16, %s75_s17, [#allocation9]  }
  0x15   :  { %s915_s20 = smov [#allocation13]  }
  0x16   :  { %s99_s21 = sshll.u32 %s915_s20, 4  ;;  %s100_s21 = int_to_ptr.vmem [resolvable:$true] %s99_s21 }
  0x17   :  { %105 = dma.hbm_to_vmem [thread:$0]  %s98_s2, 2048, %s100_s21, [#allocation12], %s907_s1, %s907_s1, %s908_s22  }
  0x18   :  { %895 = dma.done.wait [#allocation3], 128  }
  0x19   :  { %896 = vsyncadd [#allocation3], 4294967168 }
  0x1a   :  { %897 = dma.done.wait [#allocation6], 256  }
  0x1b   :  { %898 = vsyncadd [#allocation6], 4294967040 }
  0x1c   :  { %899 = dma.done.wait [#allocation9], 144  }
  0x1d   :  { %900 = vsyncadd [#allocation9], 4294967152 }
  0x1e   :  { %901 = dma.done.wait [#allocation12], 4096  }
  0x1f   :  { %902 = vsyncadd [#allocation12], 4294963200  ;;  %v654_v0 = vld [vmem:[#allocation8] sm:$0xff]  ;;  %v653_v1 = vld [vmem:[#allocation7] sm:$0xff]  ;;  %vm151_vm0 = vcmask 130048   ;;  %s916_s22 = smov [#allocation14]  }
  0x20   :  { %v139_v2 = vld [vmem:[#allocation5] sm:$0xff]  ;;  %v137_v4 = vld [vmem:[#allocation2] sm:$0xff]  ;;  %v583_v5 = vld [vmem:[#allocation11 + $0x70] sm:$0xf]  ;;  %162 = vmatpush.bf16.msra.mxu0 %v654_v0  ;;  %184 = vmatpush.bf16.msra.mxu1 %v653_v1  ;;  %s500_s23 = sshll.u32 %s916_s22, 4  ;;  %s502_s3 = sshll.u32 %s1017_s9, 4  ;;  %s501_s23 = int_to_ptr.vmem [resolvable:$true] %s500_s23  ;;  %s503_s3 = int_to_ptr.hbm [resolvable:$true] %s502_s3 }
  0x21   :  { %v140_v3 = vpack.c.bf16 %v139_v2, %v139_v2  ;;  %v670_v6 = vld [vmem:[#allocation11 + $0x74] sm:$0xf0]  ;;  %v138_v7 = vpack.c.bf16 %v137_v4, %v137_v4  ;;  %v669_v9 = vld [vmem:[#allocation11 + $0x74] sm:$0xf]  ;;  %v585_v10 = vld [vmem:[#allocation11 + $0x78] sm:$0xf0] }
  0x22   :  { %v584_v8 = vor.u32 %v670_v6, %v583_v5  ;;  %v575_v11 = vld [vmem:[#allocation11 + $0x60] sm:$0xf]  ;;  %v588_v12 = vor.u32 %v669_v9, %v585_v10  ;;  %v668_v13 = vld [vmem:[#allocation11 + $0x64] sm:$0xf0]  ;;  %v667_v14 = vld [vmem:[#allocation11 + $0x64] sm:$0xf] }
  0x23   :  { %v577_v15 = vld [vmem:[#allocation11 + $0x68] sm:$0xf0]  ;;  %v576_v16 = vor.u32 %v668_v13, %v575_v11  ;;  %519 = vmatmul.msk.bf16.vlgmr.msra.gmra.mxu0 %vm151_vm0, %v140_v3  ;;  %524 = vmatmul.msk.bf16.vlgmr.msra.gmra.mxu1 %vm151_vm0, %v138_v7  ;;  %v567_v17 = vld [vmem:[#allocation11 + $0x50] sm:$0xf]  ;;  %v666_v18 = vld [vmem:[#allocation11 + $0x54] sm:$0xf0] }
  0x24   :  { %301 = vmatpush.bf16.msra.mxu2 %v584_v8  ;;  %314 = vmatpush.bf16.msra.mxu3 %v588_v12  ;;  %v580_v19 = vor.u32 %v667_v14, %v577_v15  ;;  %v665_v20 = vld [vmem:[#allocation11 + $0x54] sm:$0xf]  ;;  %v569_v21 = vld [vmem:[#allocation11 + $0x58] sm:$0xf0]  ;;  %v568_v22 = vor.u32 %v666_v18, %v567_v17  ;;  %v559_v23 = vld [vmem:[#allocation11 + $0x40] sm:$0xf] }
  0x25   :  { %v664_v24 = vld [vmem:[#allocation11 + $0x44] sm:$0xf0]  ;;  %v572_v25 = vor.u32 %v665_v20, %v569_v21  ;;  %v663_v26 = vld [vmem:[#allocation11 + $0x44] sm:$0xf]  ;;  %v561_v27 = vld [vmem:[#allocation11 + $0x48] sm:$0xf0] }
  0x26   :  { %v560_v28 = vor.u32 %v664_v24, %v559_v23  ;;  %v551_v29 = vld [vmem:[#allocation11 + $0x30] sm:$0xf]  ;;  %v662_v30 = vld [vmem:[#allocation11 + $0x34] sm:$0xf0]  ;;  %v564_v31 = vor.u32 %v663_v26, %v561_v27  ;;  %v661_v32 = vld [vmem:[#allocation11 + $0x34] sm:$0xf] }
  0x27   :  { %v553_v33 = vld [vmem:[#allocation11 + $0x38] sm:$0xf0]  ;;  %v552_v34 = vor.u32 %v662_v30, %v551_v29  ;;  %v543_v35 = vld [vmem:[#allocation11 + $0x20] sm:$0xf]  ;;  %v660_v36 = vld [vmem:[#allocation11 + $0x24] sm:$0xf0] }
  0x28   :  { %302 = vmatpush.bf16.msra.mxu2 %v576_v16  ;;  %315 = vmatpush.bf16.msra.mxu3 %v580_v19  ;;  %v556_v37 = vor.u32 %v661_v32, %v553_v33  ;;  %v659_v38 = vld [vmem:[#allocation11 + $0x24] sm:$0xf]  ;;  %v545_v39 = vld [vmem:[#allocation11 + $0x28] sm:$0xf0]  ;;  %v544_v40 = vor.u32 %v660_v36, %v543_v35  ;;  %v535_v42 = vld [vmem:[#allocation11 + $0x10] sm:$0xf] }
  0x29   :  { %v548_v41 = vor.u32 %v659_v38, %v545_v39  ;;  %v658_v43 = vld [vmem:[#allocation11 + $0x14] sm:$0xf0]  ;;  %v657_v44 = vld [vmem:[#allocation11 + $0x14] sm:$0xf]  ;;  %v537_v46 = vld [vmem:[#allocation11 + $0x18] sm:$0xf0] }
  0x2a   :  { %v536_v45 = vor.u32 %v658_v43, %v535_v42  ;;  %v540_v47 = vor.u32 %v657_v44, %v537_v46  ;;  %v527_v48 = vld [vmem:[#allocation11] sm:$0xf]  ;;  %v656_v49 = vld [vmem:[#allocation11 + $0x4] sm:$0xf0]  ;;  %v655_v50 = vld [vmem:[#allocation11 + $0x4] sm:$0xf] }
  0x2b   :  { %v528_v51 = vor.u32 %v656_v49, %v527_v48  ;;  %v529_v52 = vld [vmem:[#allocation11 + $0x8] sm:$0xf0]  ;;  %v678_v54 = vld [vmem:[#allocation13 + $0x38] sm:$0xff]  ;;  %v677_v56 = vld [vmem:[#allocation13 + $0x30] sm:$0xff] }
  0x2c   :  { %303 = vmatpush.bf16.msra.mxu2 %v568_v22  ;;  %316 = vmatpush.bf16.msra.mxu3 %v572_v25  ;;  %v532_v53 = vor.u32 %v655_v50, %v529_v52  ;;  %v686_v55 = vld [vmem:[#allocation13 + $0x78] sm:$0xff]  ;;  %v685_v57 = vld [vmem:[#allocation13 + $0x70] sm:$0xff]  ;;  %v676_v58 = vld [vmem:[#allocation13 + $0x28] sm:$0xff] }
  0x2d   :  { %467 = vmatpush.bf16.msrb.mxu0 %v678_v54  ;;  %480 = vmatpush.bf16.msrb.mxu1 %v686_v55  ;;  %v684_v59 = vld [vmem:[#allocation13 + $0x68] sm:$0xff]  ;;  %v675_v60 = vld [vmem:[#allocation13 + $0x20] sm:$0xff]  ;;  %v674_v62 = vld [vmem:[#allocation13 + $0x18] sm:$0xff] }
  0x2e   :  { %v683_v61 = vld [vmem:[#allocation13 + $0x60] sm:$0xff]  ;;  %v682_v63 = vld [vmem:[#allocation13 + $0x58] sm:$0xff]  ;;  %v673_v0 = vld [vmem:[#allocation13 + $0x10] sm:$0xff] }
  0x2f   :  { %v681_v1 = vld [vmem:[#allocation13 + $0x50] sm:$0xff]  ;;  %v699_v2 = vld [vmem:[#allocation10] ss:$0 sm:$0xff]  ;;  %v672_v12 = vld [vmem:[#allocation13 + $0x8] sm:$0xff] }
  0x30   :  { %304 = vmatpush.bf16.msra.mxu2 %v560_v28  ;;  %317 = vmatpush.bf16.msra.mxu3 %v564_v31  ;;  %v680_v13 = vld [vmem:[#allocation13 + $0x48] sm:$0xff]  ;;  %v671_v14 = vld [vmem:[#allocation13] sm:$0xff]  ;;  %v215_v16 = vld [vmem:[%s1014_s6] sm:$0x3] }
  0x31   :  { %468 = vmatpush.bf16.msrb.mxu0 %v677_v56  ;;  %481 = vmatpush.bf16.msrb.mxu1 %v685_v57  ;;  %v679_v15 = vld [vmem:[#allocation13 + $0x40] sm:$0xff]  ;;  %v217_v17 = vperm.slane %v215_v16, 0  ;;  %v218_v18 = vperm.slane %v215_v16, 1  ;;  %v700_v31 = vld [vmem:[%s1016_s8] ss:$0 sm:$0xff] }
  0x34   :  { %305 = vmatpush.bf16.msra.mxu2 %v552_v34  ;;  %318 = vmatpush.bf16.msra.mxu3 %v556_v37 }
  0x35   :  { %469 = vmatpush.bf16.msrb.mxu0 %v676_v58  ;;  %482 = vmatpush.bf16.msrb.mxu1 %v684_v59 }
  0x38   :  { %306 = vmatpush.bf16.msra.mxu2 %v544_v40  ;;  %319 = vmatpush.bf16.msra.mxu3 %v548_v41 }
  0x39   :  { %470 = vmatpush.bf16.msrb.mxu0 %v675_v60  ;;  %483 = vmatpush.bf16.msrb.mxu1 %v683_v61 }
  0x3c   :  { %307 = vmatpush.bf16.msra.mxu2 %v536_v45  ;;  %320 = vmatpush.bf16.msra.mxu3 %v540_v47 }
  0x3d   :  { %471 = vmatpush.bf16.msrb.mxu0 %v674_v62  ;;  %484 = vmatpush.bf16.msrb.mxu1 %v682_v63 }
  0x40   :  { %308 = vmatpush.bf16.msra.mxu2 %v528_v51  ;;  %321 = vmatpush.bf16.msra.mxu3 %v532_v53 }
  0x41   :  { %472 = vmatpush.bf16.msrb.mxu0 %v673_v0  ;;  %485 = vmatpush.bf16.msrb.mxu1 %v681_v1 }
  0x45   :  { %473 = vmatpush.bf16.msrb.mxu0 %v672_v12  ;;  %486 = vmatpush.bf16.msrb.mxu1 %v680_v13 }
  0x49   :  { %474 = vmatpush.bf16.msrb.mxu0 %v671_v14  ;;  %487 = vmatpush.bf16.msrb.mxu1 %v679_v15 }
  0xa0   :  { %v164_v3 = vpop.f32.mrf.mxu0  ;;  %v186_v4 = vpop.f32.mrf.mxu1 }
  0xa1   :  { %v187_v5 = vadd.f32 %v186_v4, %v164_v3 }
  0xa3   :  { %v194_v6 = vadd.f32 %v699_v2, %v187_v5 }
  0xa5   :  { %vm195_vm1 = vcmp.gt.f32.partialorder %v194_v6, 0.0  ;;  %v196_v7 = vmul.f32 0.2, %v194_v6 }
  0xa7   :  { %v197_v8 = vsel %vm195_vm1, %v194_v6, %v196_v7 }
  0xa8   :  { %v166_v9 = vpop.f32.mrf.mxu0  ;;  %v188_v10 = vpop.f32.mrf.mxu1  ;;  %v198_v11 = vpack.c.bf16 %v197_v8, %v197_v8 }
  0xaa   :  { %309 = vmatmul.bf16.vlgmr.msra.gmra.mxu2 %v198_v11  ;;  %322 = vmatmul.bf16.vlgmr.msra.gmra.mxu3 %v198_v11 }
 0x12d   :  { %v310_v19 = vpop.f32.mrf.mxu2  ;;  %v323_v20 = vpop.f32.mrf.mxu3 }
 0x12e   :  { %v311_v21 = vadd.f32 %v310_v19, %v217_v17  ;;  %v324_v22 = vadd.f32 %v323_v20, %v218_v18 }
 0x130   :  { %vm327_vm2 = vcmp.gt.f32.partialorder %v311_v21, 0.0  ;;  %v329_v23 = vmul.f32 0.2, %v311_v21  ;;  %vm328_vm3 = vcmp.gt.f32.partialorder %v324_v22, 0.0  ;;  %v330_v24 = vmul.f32 0.2, %v324_v22 }
 0x132   :  { %v331_v25 = vsel %vm327_vm2, %v311_v21, %v329_v23  ;;  %v332_v26 = vsel %vm328_vm3, %v324_v22, %v330_v24 }
 0x133   :  { %v333_v27 = vpack.c.bf16 %v331_v25, %v331_v25  ;;  %v334_v28 = vpack.c.bf16 %v332_v26, %v332_v26 }
 0x135   :  { %v312_v29 = vpop.f32.mrf.mxu2  ;;  %v325_v30 = vpop.f32.mrf.mxu3  ;;  %475 = vmatmul.bf16.vlgmr.msrb.gmra.mxu0 %v333_v27  ;;  %488 = vmatmul.bf16.vlgmr.msrb.gmra.mxu1 %v334_v28 }
 0x1b2   :  { %v476_v32 = vpop.f32.mrf.mxu0  ;;  %v489_v33 = vpop.f32.mrf.mxu1 }
 0x1b3   :  { %v477_v34 = vadd.f32 %v700_v31, %v476_v32 }
 0x1b5   :  { %v490_v35 = vadd.f32 %v489_v33, %v477_v34 }
 0x1b7   :  { %701 = vtanh.f32 %v490_v35 }
 0x1ba   :  { %v478_v36 = vpop.f32.mrf.mxu0  ;;  %v491_v37 = vpop.f32.mrf.mxu1 }
 0x1bd   :  { %v702_v38 = vpop.eup %701 }
 0x1be   :  { %494 = vst [vmem:[#allocation14] sm:$0xff] %v702_v38 }
 0x1bf   :  { %505 = dma.vmem_to_hbm [thread:$0]  %s501_s23, 128, %s503_s3, [#allocation4]  }
 0x1c0   :  { %903 = dma.done.wait [#allocation4], 128  }
 0x1c1   :  { %904 = vsyncadd [#allocation4], 4294967168 }
 0x1c2   :  { %510 = vsyncpa [#allocation3], 1 }
 0x1c3   :  { %511 = vsyncpa [#allocation6], 1 }
 0x1c4   :  { %512 = vsyncpa [#allocation9], 1 }
 0x1c5   :  { %513 = vsyncpa [#allocation12], 1 }
 0x1c6   :  { %514 = vsyncpa [#allocation4], 1 }

</bundles_post_ra>
